<compile_context>
chip_gen: v6e
topology: v6e:2x2x1
jax: 0.10.0
libtpu: 0.0.40
codegen_flags: <defaults>
</compile_context>

<pallas_src>
import functools

import jax
import jax.numpy as jnp
from jax.experimental import pallas as pl
from jax.experimental.pallas import tpu as pltpu

LN_EPS = 1e-5  # torch.nn.LayerNorm default


def _round_up(x, m):
    return ((x + m - 1) // m) * m


def _vmem_capacity_bytes():
    """Per-TensorCore VMEM capacity; conservative 64 MiB (v7x) fallback."""
    try:
        cap = getattr(pltpu.get_tpu_info(), "vmem_capacity_bytes", None)
        if cap:
            return int(cap)
    except Exception:
        pass
    return 64 * 1024 * 1024


def prenorm_kernel(x_ref, w_ref, b_ref, o_ref, xn_ref, *, eps, dim):
    """Fused LayerNorm (affine folded into w/b) + Linear.

    Grid = (row tiles, output-column tiles), column axis innermost and
    "arbitrary".  Normalized rows are computed once per row tile (j == 0) into
    the xn VMEM scratch and reused for every column tile.
    """
    @pl.when(pl.program_id(1) == 0)
    def _():
        # One-pass LayerNorm statistics with f32 accumulation.  (E[x^2]-mean^2
        # is fine in f32 for activation-scale inputs; clamp avoids negative
        # variance from rounding.)
        x = x_ref[...].astype(jnp.float32)
        inv_d = jnp.float32(1.0 / dim)
        s1 = jnp.sum(x, axis=-1, keepdims=True)
        s2 = jnp.sum(x * x, axis=-1, keepdims=True)
        mean = s1 * inv_d
        var = jnp.maximum(s2 * inv_d - mean * mean, 0.0)
        inv = jax.lax.rsqrt(var + eps)
        xn_ref[...] = ((x - mean) * inv).astype(xn_ref.dtype)

    # fn := Linear.  MXU matmul in the (possibly bf16) operand dtype with an
    # f32 accumulator; gamma/beta were folded into w/b in the wrapper.
    out = jnp.dot(xn_ref[...], w_ref[...], preferred_element_type=jnp.float32)
    o_ref[...] = (out + b_ref[...]).astype(o_ref.dtype)


def prenorm_linear(x, gamma, beta, w, b, *, tile_rows=None, tile_cols=None,
                   use_bf16_mxu=True):
    """y = Linear(LayerNorm(x)).

    x: (B, S, D); gamma/beta: (D,); w: (D, D_out); b: (D_out,).
    """
    B, S, D = x.shape
    D_out = w.shape[1]
    R = B * S

    # --- Fold the LayerNorm affine into the linear layer (f32 math) ---
    #   (xn*gamma + beta) @ w + b  ==  xn @ (diag(gamma) @ w) + (beta @ w + b)
    w32 = w.astype(jnp.float32)
    w_f32 = gamma.astype(jnp.float32)[:, None] * w32
    b_f = beta.astype(jnp.float32) @ w32 + b.astype(jnp.float32)

    # MXU operand dtype: bf16 when weights arrive as f32 (an f32 x f32 matmul
    # is a multi-pass slow path on every generation).  use_bf16_mxu=False keeps
    # the exact-f32 path.
    if use_bf16_mxu and w.dtype == jnp.float32:
        mm_dtype = jnp.bfloat16
    else:
        mm_dtype = w.dtype
    w_f = w_f32.astype(mm_dtype)

    x2 = x.reshape(R, D)

    x_item = jnp.dtype(x.dtype).itemsize
    w_item = jnp.dtype(mm_dtype).itemsize
    o_item = jnp.dtype(x.dtype).itemsize

    # --- Generation-aware VMEM budget ---
    vmem_cap = _vmem_capacity_bytes()
    vmem_budget = min(int(vmem_cap * 0.5), 56 * 1024 * 1024)

    def est(tr_, tn_):
        return (2 * tr_ * D * x_item        # x tile (double-buffered)
                + 2 * D * tn_ * w_item      # weight tile (double-buffered)
                + 2 * tr_ * tn_ * o_item    # out tile (double-buffered)
                + 2 * tn_ * 4               # bias tile
                + tr_ * D * w_item          # xn VMEM scratch
                + 4 * tr_ * D * 4           # LN f32 temporaries (headroom)
                + tr_ * tn_ * 4)            # f32 matmul accumulator

    # --- Row tiling: dtype-native sublane multiple (8 f32 / 16 bf16 / 32 i8) ---
    sub = max(8, 32 // x_item)
    if tile_rows is None:
        tile_rows = 512 if vmem_cap >= (100 << 20) else 256
    tr = min(int(tile_rows), _round_up(R, sub))
    tr = max(sub, (tr // sub) * sub)

    # --- Output-column tiling: lane-dense; weight-resident when it fits ---
    Np_full = _round_up(D_out, 128)
    if tile_cols is None:
        tn_cap = Np_full
    else:
        tn_cap = max(128, _round_up(min(int(tile_cols), D_out), 128))

    if tn_cap >= Np_full and est(tr, Np_full) <= vmem_budget:
        # Whole weight resident: constant block index -> one HBM fetch total.
        tn = Np = Np_full
    else:
        tn = min(tn_cap, Np_full)
        if tn >= 256:
            tn = (tn // 256) * 256          # full 256-wide MXU passes (v6e/v7x)
            while tn > 256 and est(tr, tn) > vmem_budget:
                tn -= 256
        Np = _round_up(D_out, tn)

    # Shrink rows if the chosen tiles still overshoot the budget (very large D).
    while tr > sub and est(tr, tn) > vmem_budget:
        tr = max(sub, ((tr // 2) // sub) * sub)

    Rp = _round_up(R, tr)
    if Rp != R:
        x2 = jnp.pad(x2, ((0, Rp - R), (0, 0)))   # zero rows: LN stays finite

    if Np != D_out:
        w_p = jnp.pad(w_f, ((0, 0), (0, Np - D_out)))
        b_p = jnp.pad(b_f, (0, Np - D_out))
    else:
        w_p, b_p = w_f, b_f
    b2 = b_p.reshape(1, Np).astype(jnp.float32)

    grid = (Rp // tr, Np // tn)   # j innermost: x tile and xn cache stay put

    vmem_limit = int(min(max(est(tr, tn) + (4 << 20), 16 << 20),
                         int(vmem_cap * 0.6)))

    kernel = functools.partial(prenorm_kernel, eps=LN_EPS, dim=D)

    out2 = pl.pallas_call(
        kernel,
        out_shape=jax.ShapeDtypeStruct((Rp, Np), x.dtype),
        grid_spec=pltpu.PrefetchScalarGridSpec(
            num_scalar_prefetch=0,
            grid=grid,
            in_specs=[
                pl.BlockSpec((tr, D), lambda i, j: (i, 0)),   # x rows
                pl.BlockSpec((D, tn), lambda i, j: (0, j)),   # fused weight
                pl.BlockSpec((1, tn), lambda i, j: (0, j)),   # fused bias
            ],
            out_specs=pl.BlockSpec((tr, tn), lambda i, j: (i, j)),
            scratch_shapes=[pltpu.VMEM((tr, D), mm_dtype)],   # xn cache
        ),
        compiler_params=pltpu.CompilerParams(
            # j must be "arbitrary": the xn cache written at j==0 is reused by
            # all column tiles of the same row tile on the same core.
            dimension_semantics=("parallel", "arbitrary"),
            vmem_limit_bytes=vmem_limit),
    )(x2, w_p, b2)

    return out2[:R, :D_out].reshape(B, S, D_out)


def prenorm_ref(x, gamma, beta, w, b):
    xf = x.astype(jnp.float32)
    mean = jnp.mean(xf, axis=-1, keepdims=True)
    var = jnp.mean((xf - mean) ** 2, axis=-1, keepdims=True)
    xn = (xf - mean) * jax.lax.rsqrt(var + LN_EPS)
    y = xn * gamma.astype(jnp.float32) + beta.astype(jnp.float32)
    return (y @ w.astype(jnp.float32) + b.astype(jnp.float32)).astype(x.dtype)


def _make_inputs(key, B, S, D, D_out, dtype=jnp.float32):
    k_x, k_g, k_b, k_w, k_bb = jax.random.split(key, 5)
    x = jax.random.normal(k_x, (B, S, D), dtype=jnp.float32).astype(dtype)
    gamma = 1.0 + 0.1 * jax.random.normal(k_g, (D,), dtype=jnp.float32)
    beta = 0.1 * jax.random.normal(k_b, (D,), dtype=jnp.float32)
    w = (jax.random.normal(k_w, (D, D_out), dtype=jnp.float32)
         / jnp.sqrt(D)).astype(dtype)
    b = (0.1 * jax.random.normal(k_bb, (D_out,), dtype=jnp.float32)).astype(dtype)
    return x, gamma, beta, w, b


if __name__ == "__main__":
    key = jax.random.PRNGKey(0)
    k1, k2, k3 = jax.random.split(key, 3)

    # --- Case 1: small shape matching module usage; f32 in, bf16 MXU path.
    #     Small D_out exercises lane-dense output padding (32 -> 128). ---
    B, S, D = 2, 8, 32
    x, gamma, beta, w, b = _make_inputs(k1, B, S, D, D)
    out = jax.block_until_ready(prenorm_linear(x, gamma, beta, w, b))
    ref = prenorm_ref(x, gamma, beta, w, b)
    assert out.shape == (B, S, D)
    assert jnp.allclose(out, ref, atol=3e-2, rtol=3e-2), "mismatch (small, bf16 MXU)"

    # --- Case 2: exact f32 path; row padding + multi-column-tile grid so the
    #     xn VMEM cache / pl.when(j==0) path is exercised. ---
    B2, S2, D2, Do2 = 2, 72, 128, 512   # R=144 -> padded to 192 with tr=64
    x2, g2, be2, w2, b2 = _make_inputs(k2, B2, S2, D2, Do2)
    out2 = jax.block_until_ready(
        prenorm_linear(x2, g2, be2, w2, b2, tile_rows=64, tile_cols=128,
                       use_bf16_mxu=False))
    ref2 = prenorm_ref(x2, g2, be2, w2, b2)
    assert out2.shape == (B2, S2, Do2)
    assert jnp.allclose(out2, ref2, atol=1e-4, rtol=1e-4), "mismatch (tiled, f32)"

    # --- Case 3: native bf16 activations + weights (sublane multiple = 16,
    #     resident weight slab). ---
    B3, S3, D3, Do3 = 2, 40, 128, 256
    x3, g3, be3, w3, b3 = _make_inputs(k3, B3, S3, D3, Do3, dtype=jnp.bfloat16)
    out3 = jax.block_until_ready(prenorm_linear(x3, g3, be3, w3, b3))
    ref3 = prenorm_ref(x3, g3, be3, w3, b3)
    assert out3.shape == (B3, S3, Do3)
    assert jnp.allclose(out3.astype(jnp.float32), ref3.astype(jnp.float32),
                        atol=6e-2, rtol=6e-2), "mismatch (bf16)"

    print("KERNEL_OK")
</pallas_src>

<mosaic_0001>
module attributes {stable_mosaic.version = 11 : i64} {
  func.func @prenorm_kernel(%arg0: i32, %arg1: i32, %arg2: memref<16x32xf32, #tpu.memory_space<vmem>>, %arg3: memref<32x128xbf16, #tpu.memory_space<vmem>>, %arg4: memref<1x128xf32, #tpu.memory_space<vmem>>, %arg5: memref<16x128xf32, #tpu.memory_space<vmem>>, %arg6: memref<16x32xbf16, #tpu.memory_space<vmem>>) attributes {dimension_semantics = [#tpu.dimension_semantics<parallel>, #tpu.dimension_semantics<arbitrary>], iteration_bounds = array<i64: 1, 1>, scalar_prefetch = 0 : i64, scratch_operands = 1 : i64, tpu.core_type = #tpu.core_type<tc>, window_params = [{transform_indices = @transform_0, window_bounds = array<i64: 16, 32>}, {transform_indices = @transform_1, window_bounds = array<i64: 32, 128>}, {transform_indices = @transform_2, window_bounds = array<i64: 1, 128>}, {transform_indices = @transform_3, window_bounds = array<i64: 16, 128>}]} {
    %c0_i32 = arith.constant 0 : i32
    %0 = arith.cmpi eq, %arg1, %c0_i32 : i32
    %1 = arith.extui %0 : i1 to i32
    %c0_i32_0 = arith.constant 0 : i32
    %2 = arith.cmpi ne, %1, %c0_i32_0 : i32
    scf.if %2 {
      %c0_8 = arith.constant 0 : index
      %c0_9 = arith.constant 0 : index
      %10 = vector.load %arg2[%c0_8, %c0_9] : memref<16x32xf32, #tpu.memory_space<vmem>>, vector<16x32xf32>
      %cst_10 = arith.constant dense<0.000000e+00> : vector<16xf32>
      %11 = vector.multi_reduction <add>, %10, %cst_10 [1] : vector<16x32xf32> to vector<16xf32>
      %12 = vector.shape_cast %11 : vector<16xf32> to vector<16x1xf32>
      %13 = arith.mulf %10, %10 : vector<16x32xf32>
      %cst_11 = arith.constant dense<0.000000e+00> : vector<16xf32>
      %14 = vector.multi_reduction <add>, %13, %cst_11 [1] : vector<16x32xf32> to vector<16xf32>
      %15 = vector.shape_cast %14 : vector<16xf32> to vector<16x1xf32>
      %cst_12 = arith.constant 3.125000e-02 : f32
      %16 = vector.broadcast %cst_12 : f32 to vector<16x1xf32>
      %17 = arith.mulf %12, %16 : vector<16x1xf32>
      %cst_13 = arith.constant 3.125000e-02 : f32
      %18 = vector.broadcast %cst_13 : f32 to vector<16x1xf32>
      %19 = arith.mulf %15, %18 : vector<16x1xf32>
      %20 = arith.mulf %17, %17 : vector<16x1xf32>
      %21 = arith.subf %19, %20 : vector<16x1xf32>
      %cst_14 = arith.constant 0.000000e+00 : f32
      %22 = vector.broadcast %cst_14 : f32 to vector<16x1xf32>
      %23 = arith.maximumf %21, %22 : vector<16x1xf32>
      %cst_15 = arith.constant 9.99999974E-6 : f32
      %24 = vector.broadcast %cst_15 : f32 to vector<16x1xf32>
      %25 = arith.addf %23, %24 : vector<16x1xf32>
      %26 = math.rsqrt %25 : vector<16x1xf32>
      %27 = vector.broadcast %17 : vector<16x1xf32> to vector<16x32xf32>
      %28 = arith.subf %10, %27 : vector<16x32xf32>
      %29 = vector.broadcast %26 : vector<16x1xf32> to vector<16x32xf32>
      %30 = arith.mulf %28, %29 : vector<16x32xf32>
      %31 = arith.truncf %30 : vector<16x32xf32> to vector<16x32xbf16>
      %c0_16 = arith.constant 0 : index
      %c0_17 = arith.constant 0 : index
      %32 = vector.load %arg6[%c0_16, %c0_17] : memref<16x32xbf16, #tpu.memory_space<vmem>>, vector<16x32xbf16>
      tpu.vector_store %arg6[%c0_16, %c0_17], %31 {strides = array<i32>} : memref<16x32xbf16, #tpu.memory_space<vmem>>, vector<16x32xbf16>,
    } else {
    }
    %c0 = arith.constant 0 : index
    %c0_1 = arith.constant 0 : index
    %3 = vector.load %arg6[%c0, %c0_1] : memref<16x32xbf16, #tpu.memory_space<vmem>>, vector<16x32xbf16>
    %c0_2 = arith.constant 0 : index
    %c0_3 = arith.constant 0 : index
    %4 = vector.load %arg3[%c0_2, %c0_3] : memref<32x128xbf16, #tpu.memory_space<vmem>>, vector<32x128xbf16>
    %cst = arith.constant dense<0.000000e+00> : vector<16x128xf32>
    %5 = tpu.matmul %3, %4, %cst {dimension_numbers = #tpu.dot_dimension_numbers<[1], [0], [0], [1], [0, 0, 1, 1], [], []>} : vector<16x32xbf16>, vector<32x128xbf16>, vector<16x128xf32> -> vector<16x128xf32>
    %c0_4 = arith.constant 0 : index
    %c0_5 = arith.constant 0 : index
    %6 = vector.load %arg4[%c0_4, %c0_5] : memref<1x128xf32, #tpu.memory_space<vmem>>, vector<1x128xf32>
    %7 = vector.broadcast %6 : vector<1x128xf32> to vector<16x128xf32>
    %8 = arith.addf %5, %7 : vector<16x128xf32>
    %c0_6 = arith.constant 0 : index
    %c0_7 = arith.constant 0 : index
    %9 = vector.load %arg5[%c0_6, %c0_7] : memref<16x128xf32, #tpu.memory_space<vmem>>, vector<16x128xf32>
    tpu.vector_store %arg5[%c0_6, %c0_7], %8 {strides = array<i32>} : memref<16x128xf32, #tpu.memory_space<vmem>>, vector<16x128xf32>,
    return
  }
  func.func @transform_0(%arg0: i32, %arg1: i32) -> (i32, i32) {
    %c0_i32 = arith.constant 0 : i32
    %c0_i32_0 = arith.constant 0 : i32
    return %arg0, %c0_i32 : i32, i32
  }
  func.func @transform_1(%arg0: i32, %arg1: i32) -> (i32, i32) {
    %c0_i32 = arith.constant 0 : i32
    %c0_i32_0 = arith.constant 0 : i32
    return %c0_i32, %arg1 : i32, i32
  }
  func.func @transform_2(%arg0: i32, %arg1: i32) -> (i32, i32) {
    %c0_i32 = arith.constant 0 : i32
    %c0_i32_0 = arith.constant 0 : i32
    return %c0_i32, %arg1 : i32, i32
  }
  func.func @transform_3(%arg0: i32, %arg1: i32) -> (i32, i32) {
    %c0_i32 = arith.constant 0 : i32
    return %arg0, %arg1 : i32, i32
  }
}

</mosaic_0001>

<bundles_post_ra>
// kernel: tpu_custom_call.1
= control target key start
LH: loop header
LB: loop body
LE: loop exit
PB: predicated region body
PF: predicated region fallthrough
CT: control target
= control target key end

     0   :  { %8 = vsyncpa [#allocation4], 0  ;;  %s343_s0 = inlined_call_operand.hbm [shape: f32[16,32], index: 0, kind: input, shape index: {}]   ;;  %s344_s1 = inlined_call_operand.hbm [shape: bf16[32,128], index: 1, kind: input, shape index: {}]   ;;  %s345_s2 = inlined_call_operand.vmem [shape: f32[1,128], index: 2, kind: input, shape index: {}]   ;;  %s346_s3 = inlined_call_operand.hbm [shape: f32[16,128], index: 3, kind: output, shape index: {}]  }
   0x1   :  { %9 = vsyncpa [#allocation7], 0 }
   0x2   :  { %10 = vsyncpa [#allocation5], 0  ;;  %s291_s12 = smov [#allocation3]  }
   0x3   :  { %s16_s13 = sshll.u32 %s291_s12, 4  ;;  %s17_s13 = int_to_ptr.vmem [resolvable:$true] %s16_s13 }
   0x4   :  { %s233_s14 = scalar_lea.vmem %s17_s13, 256  ;;  %p238_p1 = scmp.lt.s32.totalorder %s17_s13, %s17_s13 }
   0x5   :  { %p234_p0 = scmp.ne.s32.totalorder %s17_s13, %s233_s14  ;;  %p239_p2 = scmp.lt.s32.totalorder %s233_s14, %s233_s14 }
   0x7   :  { %p240_p3 = por %p239_p2, %p238_p1 }
   0x9   :  { %p241_p4 = pnand %p240_p3, %p234_p0 }
   0xb   :  { %244 = shalt.err (!%p241_p4)
}
   0xc   :  { %s292_s15 = smov 128   ;;  %s293_s16 = smov 8  }
   0xd   :  { %22 = dma.hbm_to_vmem [thread:$0]  %s343_s0, 256, %s17_s13, [#allocation4], %s292_s15, %s292_s15, %s293_s16  }
   0xe   :  { %s294_s19 = smov [#allocation6]  }
   0xf   :  { %s28_s20 = sshll.u32 %s294_s19, 4  ;;  %s29_s20 = int_to_ptr.vmem [resolvable:$true] %s28_s20 }
  0x10   :  { %s253_s21 = scalar_lea.vmem %s29_s20, 256  ;;  %p258_p6 = scmp.lt.s32.totalorder %s29_s20, %s29_s20 }
  0x11   :  { %p254_p5 = scmp.ne.s32.totalorder %s29_s20, %s253_s21  ;;  %p259_p7 = scmp.lt.s32.totalorder %s253_s21, %s253_s21 }
  0x13   :  { %p260_p8 = por %p259_p7, %p258_p6 }
  0x15   :  { %p261_p9 = pnand %p260_p8, %p254_p5 }
  0x17   :  { %264 = shalt.err (!%p261_p9)
}
  0x18   :  { %s295_s22 = smov 64   ;;  %s296_s23 = smov 4  }
  0x19   :  { %34 = dma.hbm_to_vmem [thread:$0]  %s344_s1, 256, %s29_s20, [#allocation7], %s295_s22, %s295_s22, %s296_s23  }
  0x1a   :  { %285 = dma.done.wait [#allocation4], 256  }
  0x1b   :  { %286 = vsyncadd [#allocation4], 4294967040 }
  0x1c   :  { %287 = dma.done.wait [#allocation7], 256  }
  0x1d   :  { %288 = vsyncadd [#allocation7], 4294967040  ;;  %vm50_vm0 = vcmask 261120   ;;  %v48_v0 = vld [vmem:[#allocation3] sm:$0xff]  ;;  %v49_v1 = vld [vmem:[#allocation3 + $0x8] sm:$0xff]  ;;  %v297_v9 = vmov 0.0  }
  0x1e   :  { %v51_v2 = vsel %vm50_vm0, %v48_v0, 0.0  ;;  %v57_v3 = vmul.f32 %v48_v0, %v48_v0  ;;  %v58_v4 = vmul.f32 %v49_v1, %v49_v1  ;;  %v54_v6 = vsel %vm50_vm0, %v49_v1, 0.0  ;;  %v218_v8 = vld [vmem:[#allocation6 + $0x8] sm:$0xff]   ;;  %201 = vmatprep.subr.bf16.mxu0 %v297_v9  ;;  %v219_v10 = vld [vmem:[#allocation6] sm:$0xff]   ;;  %s299_s26 = smov [#allocation8]  }
  0x1f   :  { %52 = vadd.xlane.f32.xlu0 %v51_v2  ;;  %vm298_vm1 = vmmov 0   ;;  %202 = vmatpush3.bf16.msra.mxu0 %v218_v8  ;;  %vm91_vm2 = vcmask 257024   ;;  %v191_v36 = vld [vmem:[%s345_s2] ss:$0 sm:$0xff]  ;;  %s176_s27 = sshll.u32 %s299_s26, 4  ;;  %s177_s27 = int_to_ptr.vmem [resolvable:$true] %s176_s27 }
  0x20   :  { %v59_v5 = vsel %vm50_vm0, %v57_v3, 0.0  ;;  %v62_v7 = vsel %vm50_vm0, %v58_v4, 0.0  ;;  %205 = vmatprep.mubr.msk.bf16.mxu0 %vm298_vm1, %v297_v9  ;;  %203 = vmatprep.subr.bf16.mxu0 %v297_v9  ;;  %s265_s28 = scalar_lea.vmem %s177_s27, 256  ;;  %p270_p11 = scmp.lt.s32.totalorder %s177_s27, %s177_s27 }
  0x21   :  { %60 = vadd.xlane.f32.xlu1 %v59_v5  ;;  %p266_p10 = scmp.ne.s32.totalorder %s177_s27, %s265_s28  ;;  %p271_p12 = scmp.lt.s32.totalorder %s265_s28, %s265_s28 }
  0x23   :  { %55 = vadd.xlane.f32.xlu0 %v54_v6  ;;  %204 = vmatpush3.bf16.msra.mxu0 %v219_v10  ;;  %p272_p13 = por %p271_p12, %p270_p11 }
  0x25   :  { %63 = vadd.xlane.f32.xlu1 %v62_v7  ;;  %p273_p0 = pnand %p272_p13, %p266_p10 }
  0xa8   :  { %v53_v11 = vpop.xlane.xlu0 %52 }
  0xa9   :  { %v65_v12 = vmul.f32 0.03125, %v53_v11 }
  0xaa   :  { %v61_v13 = vpop.xlane.xlu1 %60 }
  0xab   :  { %v69_v14 = vmul.f32 %v65_v12, %v65_v12  ;;  %v67_v15 = vmul.f32 0.03125, %v61_v13  ;;  %v79_v27 = vsub.f32 %v48_v0, %v65_v12 }
  0xac   :  { %v56_v16 = vpop.xlane.xlu0 %55 }
  0xad   :  { %v71_v17 = vsub.f32 %v67_v15, %v69_v14  ;;  %v66_v18 = vmul.f32 0.03125, %v56_v16 }
  0xae   :  { %v64_v19 = vpop.xlane.xlu1 %63 }
  0xaf   :  { %v73_v20 = vmax.f32 %v71_v17, 0.0  ;;  %v70_v21 = vmul.f32 %v66_v18, %v66_v18  ;;  %v68_v22 = vmul.f32 0.03125, %v64_v19  ;;  %v80_v31 = vsub.f32 %v49_v1, %v66_v18 }
  0xb1   :  { %v75_v23 = vadd.f32 1e-05, %v73_v20  ;;  %v72_v24 = vsub.f32 %v68_v22, %v70_v21 }
  0xb3   :  { %221 = vrsqrt.f32 %v75_v23  ;;  %v74_v25 = vmax.f32 %v72_v24, 0.0 }
  0xb5   :  { %v76_v26 = vadd.f32 1e-05, %v74_v25 }
  0xb7   :  { %223 = vrsqrt.f32 %v76_v26 }
  0xc0   :  { %v222_v28 = vpop.eup %221 }
  0xc1   :  { %v81_v29 = vmul.f32 %v222_v28, %v79_v27 }
  0xc3   :  { %v196_v30 = vpack.c.bf16 %v81_v29, %v81_v29 }
  0xc4   :  { %v224_v32 = vpop.eup %223 }
  0xc5   :  { %92 = vst.msk [vmem:[#allocation2] sm:$0xf] %vm91_vm2, %v196_v30  ;;  %v82_v33 = vmul.f32 %v224_v32, %v80_v31 }
  0xc7   :  { %v197_v34 = vpack.c.bf16 %v82_v33, %v82_v33 }
  0xc9   :  { %93 = vst.msk [vmem:[#allocation2 + $0x4] sm:$0xf] %vm91_vm2, %v197_v34 }
  0xd0   :  { %v220_v35 = vld [vmem:[#allocation2] sm:$0xff]  }
  0xd1   :  { %206 = vmatmul.mubr.msk.bf16.vlgmr.msra.gmra.mxu0 %vm50_vm0, %v220_v35 }
 0x191   :  { %v162_v37 = vpop.f32.mrf.mxu0 }
 0x192   :  { %v163_v38 = vadd.f32 %v191_v36, %v162_v37 }
 0x193   :  { %v207_v39 = vpop.f32.mrf.mxu0 }
 0x194   :  { %169 = vst [vmem:[#allocation8] sm:$0xff] %v163_v38 }
 0x195   :  { %v165_v40 = vpop.f32.mrf.mxu0 }
 0x196   :  { %v166_v41 = vadd.f32 %v191_v36, %v165_v40 }
 0x197   :  { %v208_v42 = vpop.f32.mrf.mxu0 }
 0x198   :  { %170 = vst [vmem:[#allocation8 + $0x8] sm:$0xff] %v166_v41 }
 0x199   :  { %276 = shalt.err (!%p273_p0)
}
 0x19a   :  { %182 = dma.vmem_to_hbm [thread:$0]  %s177_s27, 256, %s346_s3, [#allocation5], %s292_s15, %s292_s15, %s293_s16  }
 0x19b   :  { %289 = dma.done.wait [#allocation5], 256  }
 0x19c   :  { %290 = vsyncadd [#allocation5], 4294967040 }
 0x19d   :  { %186 = vsyncpa [#allocation4], 1 }
 0x19e   :  { %187 = vsyncpa [#allocation7], 1 }
 0x19f   :  { %188 = vsyncpa [#allocation5], 1 }

</bundles_post_ra>
